<compile_context>
chip_gen: v6e
topology: v6e:2x2x1
jax: 0.10.0
libtpu: 0.0.40
codegen_flags: <defaults>
</compile_context>

<pallas_src>
import functools

import jax
import jax.numpy as jnp
from jax.experimental import pallas as pl
from jax.experimental.pallas import tpu as pltpu


# ----------------------------- small helpers -------------------------------

def _round_up(x, m):
    return ((x + m - 1) // m) * m


def _silu(y):
    # y: f32. exp -> EUP; approx reciprocal -> EUP (keeps the VALU slot free).
    return y * pl.reciprocal(1.0 + jnp.exp(-y), approx=True)


def _sigmoid(y):
    return pl.reciprocal(1.0 + jnp.exp(-y), approx=True)


def _apply_act(y, act):
    if act == "silu":
        return _silu(y)
    if act == "sigmoid":
        return _sigmoid(y)
    return y


_PAR1 = pltpu.CompilerParams(dimension_semantics=("parallel",))
_PAR_ARB = pltpu.CompilerParams(dimension_semantics=("parallel", "arbitrary"))
_PAR_PAR = pltpu.CompilerParams(dimension_semantics=("parallel", "parallel"))


# ----------------------------- Pallas kernels ------------------------------

def _mm_kernel(x_ref, w_ref, b_ref, o_ref, *, act):
    # x: (tm, K) bf16, w: (K, N) bf16, b: (1, N) f32
    y = jnp.dot(x_ref[...], w_ref[...], preferred_element_type=jnp.float32)
    o_ref[...] = _apply_act(y + b_ref[...], act).astype(o_ref.dtype)


def matmul_bias_act(x, w, b, act="none", out_dtype=jnp.bfloat16, tm=128):
    """y = act(x @ w + b); M padded to a multiple of a fixed tile and tiled."""
    M, K = x.shape
    N = w.shape[1]
    tm = min(tm, _round_up(M, 8))
    Mp = _round_up(M, tm)
    if Mp != M:
        x = jnp.pad(x, ((0, Mp - M), (0, 0)))
    out = pl.pallas_call(
        functools.partial(_mm_kernel, act=act),
        out_shape=jax.ShapeDtypeStruct((Mp, N), out_dtype),
        grid=(Mp // tm,),
        in_specs=[pl.BlockSpec((tm, K), lambda i: (i, 0)),
                  pl.BlockSpec((K, N), lambda i: (0, 0)),
                  pl.BlockSpec((1, N), lambda i: (0, 0))],
        out_specs=pl.BlockSpec((tm, N), lambda i: (i, 0)),
        compiler_params=_PAR1,
    )(x, w, b.reshape(1, N))
    return out[:M] if Mp != M else out


def _dw_kernel(p_ref, w_ref, b_ref, o_ref, *, taps):
    # Tap-major depthwise conv: p (T, tm, C) bf16, w (T, 1, C) f32, b (1, C) f32.
    # Unrolled FMA over lane-aligned (tm, C) tiles (f32 VPU math: safe on v5e too).
    acc = p_ref[0].astype(jnp.float32) * w_ref[0]
    for t in range(1, taps):
        acc = acc + p_ref[t].astype(jnp.float32) * w_ref[t]
    o_ref[...] = _silu(acc + b_ref[...]).astype(o_ref.dtype)


def depthwise_apply(patches, w, b, tm=128):
    T, M, C = patches.shape
    tm = min(tm, _round_up(M, 8))
    Mp = _round_up(M, tm)
    if Mp != M:
        patches = jnp.pad(patches, ((0, 0), (0, Mp - M), (0, 0)))
    out = pl.pallas_call(
        functools.partial(_dw_kernel, taps=T),
        out_shape=jax.ShapeDtypeStruct((Mp, C), jnp.bfloat16),
        grid=(Mp // tm,),
        in_specs=[pl.BlockSpec((T, tm, C), lambda i: (0, i, 0)),
                  pl.BlockSpec((T, 1, C), lambda i: (0, 0, 0)),
                  pl.BlockSpec((1, C), lambda i: (0, 0))],
        out_specs=pl.BlockSpec((tm, C), lambda i: (i, 0)),
        compiler_params=_PAR1,
    )(patches, w, b.reshape(1, C))
    return out[:M] if Mp != M else out


def _se_kernel(h_ref, w1_ref, b1_ref, w2_ref, b2_ref, s_ref, acc_ref, *, inv_hw):
    # Fused Squeeze-and-Excitation: GAP over HW tiles + 2 tiny FCs -> gate (1, Ce).
    hw = pl.program_id(1)

    @pl.when(hw == 0)
    def _init():
        acc_ref[...] = jnp.zeros_like(acc_ref)

    acc_ref[...] += jnp.sum(h_ref[0].astype(jnp.float32), axis=0, keepdims=True)

    @pl.when(hw == pl.num_programs(1) - 1)
    def _finish():
        g = (acc_ref[...] * inv_hw).astype(jnp.bfloat16)                     # (1, Ce)
        z = jnp.dot(g, w1_ref[...], preferred_element_type=jnp.float32) + b1_ref[...]
        z = _silu(z).astype(jnp.bfloat16)
        e = jnp.dot(z, w2_ref[...], preferred_element_type=jnp.float32) + b2_ref[...]
        s_ref[0] = _sigmoid(e)


def se_gate(h, hw_true, w1, b1, w2, b2, thw):
    """h: (N, HWp, Ce) bf16 (zero-padded rows) -> per-(batch, channel) gate (N,1,Ce) f32."""
    N, HWp, Ce = h.shape
    Csq = w1.shape[1]
    return pl.pallas_call(
        functools.partial(_se_kernel, inv_hw=1.0 / float(hw_true)),
        out_shape=jax.ShapeDtypeStruct((N, 1, Ce), jnp.float32),
        grid=(N, HWp // thw),
        in_specs=[pl.BlockSpec((1, thw, Ce), lambda n, i: (n, i, 0)),
                  pl.BlockSpec((Ce, Csq), lambda n, i: (0, 0)),
                  pl.BlockSpec((1, Csq), lambda n, i: (0, 0)),
                  pl.BlockSpec((Csq, Ce), lambda n, i: (0, 0)),
                  pl.BlockSpec((1, Ce), lambda n, i: (0, 0))],
        out_specs=pl.BlockSpec((1, 1, Ce), lambda n, i: (n, 0, 0)),
        scratch_shapes=[pltpu.VMEM((1, Ce), jnp.float32)],
        compiler_params=_PAR_ARB,
    )(h, w1, b1.reshape(1, Csq), w2, b2.reshape(1, Ce))


def _proj_kernel(x_ref, s_ref, w_ref, b_ref, o_ref):
    # SE gate folded into the projection: scale x before the dot.
    xs = (x_ref[0].astype(jnp.float32) * s_ref[0]).astype(jnp.bfloat16)
    y = jnp.dot(xs, w_ref[...], preferred_element_type=jnp.float32) + b_ref[...]
    o_ref[0] = y.astype(o_ref.dtype)


def _proj_res_kernel(x_ref, s_ref, w_ref, b_ref, r_ref, o_ref):
    xs = (x_ref[0].astype(jnp.float32) * s_ref[0]).astype(jnp.bfloat16)
    y = jnp.dot(xs, w_ref[...], preferred_element_type=jnp.float32) + b_ref[...]
    o_ref[0] = (y + r_ref[0].astype(jnp.float32)).astype(o_ref.dtype)


def project_conv(h, gate, w, b, residual, thw):
    """SE-scaled 1x1 projection (+ residual). h: (N, HWp, Ce) bf16; gate: (N,1,Ce) f32."""
    N, HWp, Ce = h.shape
    Cout = w.shape[1]
    b2 = b.reshape(1, Cout)
    common = dict(
        out_shape=jax.ShapeDtypeStruct((N, HWp, Cout), jnp.bfloat16),
        grid=(N, HWp // thw),
        out_specs=pl.BlockSpec((1, thw, Cout), lambda n, i: (n, i, 0)),
        compiler_params=_PAR_PAR,
    )
    base_specs = [pl.BlockSpec((1, thw, Ce), lambda n, i: (n, i, 0)),
                  pl.BlockSpec((1, 1, Ce), lambda n, i: (n, 0, 0)),
                  pl.BlockSpec((Ce, Cout), lambda n, i: (0, 0)),
                  pl.BlockSpec((1, Cout), lambda n, i: (0, 0))]
    if residual is None:
        return pl.pallas_call(_proj_kernel, in_specs=base_specs, **common)(h, gate, w, b2)
    specs = base_specs + [pl.BlockSpec((1, thw, Cout), lambda n, i: (n, i, 0))]
    return pl.pallas_call(_proj_res_kernel, in_specs=specs, **common)(h, gate, w, b2, residual)


def _head_kernel(x_ref, wh_ref, bh_ref, wf_ref, bf_ref, o_ref, acc_ref,
                 *, inv_hw, hw_total, thw):
    # Fused: head 1x1 conv (SiLU) + adaptive avg-pool + classifier Linear.
    hw = pl.program_id(1)

    @pl.when(hw == 0)
    def _init():
        acc_ref[...] = jnp.zeros_like(acc_ref)

    y = jnp.dot(x_ref[0], wh_ref[...], preferred_element_type=jnp.float32) + bh_ref[...]
    y = _silu(y)
    row = jax.lax.broadcasted_iota(jnp.int32, (thw, 1), 0) + hw * thw
    y = jnp.where(row < hw_total, y, 0.0)              # mask zero-padded spatial rows
    acc_ref[...] += jnp.sum(y, axis=0, keepdims=True)

    @pl.when(hw == pl.num_programs(1) - 1)
    def _finish():
        g = (acc_ref[...] * inv_hw).astype(jnp.bfloat16)
        o_ref[0] = (jnp.dot(g, wf_ref[...], preferred_element_type=jnp.float32)
                    + bf_ref[...]).astype(o_ref.dtype)


def head_pool_fc(x, wh, bh, wf, bf):
    N, H, W, C = x.shape
    HW = H * W
    thw = min(256, _round_up(HW, 8))
    HWp = _round_up(HW, thw)
    xf = x.reshape(N, HW, C)
    if HWp != HW:
        xf = jnp.pad(xf, ((0, 0), (0, HWp - HW), (0, 0)))
    Ch = wh.shape[1]
    NC = wf.shape[1]
    out = pl.pallas_call(
        functools.partial(_head_kernel, inv_hw=1.0 / float(HW), hw_total=HW, thw=thw),
        out_shape=jax.ShapeDtypeStruct((N, 1, NC), jnp.float32),
        grid=(N, HWp // thw),
        in_specs=[pl.BlockSpec((1, thw, C), lambda n, i: (n, i, 0)),
                  pl.BlockSpec((C, Ch), lambda n, i: (0, 0)),
                  pl.BlockSpec((1, Ch), lambda n, i: (0, 0)),
                  pl.BlockSpec((Ch, NC), lambda n, i: (0, 0)),
                  pl.BlockSpec((1, NC), lambda n, i: (0, 0))],
        out_specs=pl.BlockSpec((1, 1, NC), lambda n, i: (n, 0, 0)),
        scratch_shapes=[pltpu.VMEM((1, Ch), jnp.float32)],
        compiler_params=_PAR_ARB,
    )(xf, wh, bh.reshape(1, Ch), wf, bf.reshape(1, NC))
    return out.reshape(N, NC)


# ----------------------------- JAX glue (layout) ---------------------------

def _tap_patches(x, k, stride, pad):
    """NHWC -> tap-major patches (k*k, N*Ho*Wo, C); pure rearrangement."""
    N, H, W, C = x.shape
    xp = jnp.pad(x, ((0, 0), (pad, pad), (pad, pad), (0, 0)))
    Ho = (H + 2 * pad - k) // stride + 1
    Wo = (W + 2 * pad - k) // stride + 1
    taps = []
    for i in range(k):
        for j in range(k):
            taps.append(xp[:, i:i + stride * Ho:stride, j:j + stride * Wo:stride, :])
    p = jnp.stack(taps, axis=0)
    return p.reshape(k * k, N * Ho * Wo, C), Ho, Wo


def conv2d_stem(x, w, b, k, stride, pad):
    # TODO(synk): im2col is acceptable for the tiny 3x3/Cin=3 stem; a direct
    # halo-DMA Pallas conv would be preferable for large inputs.
    N, H, W, C = x.shape
    p, Ho, Wo = _tap_patches(x, k, stride, pad)                 # (T, M, C)
    M = N * Ho * Wo
    p = jnp.transpose(p, (1, 0, 2)).reshape(M, k * k * C)       # im2col (M, T*C)
    y = matmul_bias_act(p, w, b, act="silu")
    return y.reshape(N, Ho, Wo, -1)


def conv1x1(x, w, b, act="none"):
    N, H, W, C = x.shape
    y = matmul_bias_act(x.reshape(N * H * W, C), w, b, act=act)
    return y.reshape(N, H, W, w.shape[1])


def depthwise_conv(x, w, b, k, stride, pad):
    N, H, W, C = x.shape
    p, Ho, Wo = _tap_patches(x, k, stride, pad)
    y = depthwise_apply(p, w, b)
    return y.reshape(N, Ho, Wo, C), Ho, Wo


# ------------------------- EfficientNet-B0 structure -----------------------

# (expand_ratio, kernel, stride, in_ch, out_ch, repeats)
MBCONV_CFG = [
    (1, 3, 1, 32, 16, 1),
    (6, 3, 2, 16, 24, 2),
    (6, 5, 2, 24, 40, 2),
    (6, 3, 2, 40, 80, 3),
    (6, 5, 1, 80, 112, 3),
    (6, 5, 2, 112, 192, 4),
    (6, 3, 1, 192, 320, 1),
]


def mbconv(x, p):
    expand, k, stride, cin, cout = p["cfg"]
    inp = x
    h = x
    if expand != 1:
        h = conv1x1(h, p["expand_w"], p["expand_b"], act="silu")
    h, Ho, Wo = depthwise_conv(h, p["dw_w"], p["dw_b"], k, stride, (k - 1) // 2)
    N, Ce = h.shape[0], h.shape[-1]
    HW = Ho * Wo
    thw = min(256, _round_up(HW, 8))
    HWp = _round_up(HW, thw)
    h_flat = h.reshape(N, HW, Ce)
    if HWp != HW:
        h_flat = jnp.pad(h_flat, ((0, 0), (0, HWp - HW), (0, 0)))  # zeros: safe for GAP sum
    # fused SE (GAP + squeeze + excite) -> per-(batch, channel) gate
    gate = se_gate(h_flat, HW, p["se1_w"], p["se1_b"], p["se2_w"], p["se2_b"], thw)
    # SE scaling folded into the projection conv (+ residual when applicable)
    use_res = (stride == 1 and cin == cout)
    r = None
    if use_res:
        r = inp.reshape(N, HW, cin)
        if HWp != HW:
            r = jnp.pad(r, ((0, 0), (0, HWp - HW), (0, 0)))
    # TODO(synk): stochastic depth is identity at inference; not modeled.
    y = project_conv(h_flat, gate, p["proj_w"], p["proj_b"], r, thw)
    return y[:, :HW].reshape(N, Ho, Wo, cout)


def init_params(key, num_classes):
    keys = iter(jax.random.split(key, 512))

    def nk():
        return next(keys)

    def lin(fan_in, cout):
        # conv/linear weight with BatchNorm pre-folded (inference semantics); bf16 for MXU
        w = (jax.random.normal(nk(), (fan_in, cout), jnp.float32)
             / jnp.sqrt(fan_in)).astype(jnp.bfloat16)
        b = jax.random.normal(nk(), (cout,), jnp.float32) * 0.01
        return w, b

    params = {}
    # stem: Conv2d(3, 32, k=3, s=2, p=1) + BN(folded) + SiLU
    params["stem_w"], params["stem_b"] = lin(3 * 3 * 3, 32)

    blocks = []
    for (expand, k, stride, cin, cout, reps) in MBCONV_CFG:
        for r in range(reps):
            bcin = cin if r == 0 else cout
            bstride = stride if r == 0 else 1
            ce = bcin * expand
            csq = max(1, bcin // 4)
            bp = {"cfg": (expand, k, bstride, bcin, cout)}
            if expand != 1:
                bp["expand_w"], bp["expand_b"] = lin(bcin, ce)
            # depthwise weights kept f32 (VPU path; v5e has no bf16 VPU)
            bp["dw_w"] = jax.random.normal(nk(), (k * k, 1, ce), jnp.float32) / float(k)
            bp["dw_b"] = jax.random.normal(nk(), (ce,), jnp.float32) * 0.01
            bp["se1_w"], bp["se1_b"] = lin(ce, csq)
            bp["se2_w"], bp["se2_b"] = lin(csq, ce)
            bp["proj_w"], bp["proj_b"] = lin(ce, cout)
            blocks.append(bp)
    params["blocks"] = blocks
    # head 1x1 conv 320 -> 1280, BN(folded), SiLU
    params["head_w"], params["head_b"] = lin(320, 1280)
    # replaced classifier: Linear(1280, num_classes)
    params["fc_w"], params["fc_b"] = lin(1280, num_classes)
    return params


def fine_grained_model_forward(params, x_nchw):
    # layout: NCHW (PyTorch) -> NHWC for the Pallas kernels; activations in bf16
    x = jnp.transpose(x_nchw, (0, 2, 3, 1)).astype(jnp.bfloat16)
    x = conv2d_stem(x, params["stem_w"], params["stem_b"], k=3, stride=2, pad=1)
    for bp in params["blocks"]:
        x = mbconv(x, bp)
    # fused head conv (SiLU) + adaptive avg pool + Linear; Dropout(0.2) is identity.
    logits = head_pool_fc(x, params["head_w"], params["head_b"],
                          params["fc_w"], params["fc_b"])
    return logits


if __name__ == "__main__":
    num_classes = 10
    key = jax.random.PRNGKey(0)
    pkey, xkey = jax.random.split(key)
    params = init_params(pkey, num_classes)
    # small NCHW input (PyTorch convention); 32x32 -> 1x1 after the 5 stride-2 stages
    x = jax.random.normal(xkey, (2, 3, 32, 32), jnp.float32)
    logits = fine_grained_model_forward(params, x)
    jax.block_until_ready(logits)
    assert logits.shape == (2, num_classes)
    assert bool(jnp.all(jnp.isfinite(logits)))
    print("KERNEL_OK")
</pallas_src>

<mosaic_0001>
module attributes {stable_mosaic.version = 11 : i64} {
  func.func @_mm_kernel(%arg0: i32, %arg1: memref<128x27xbf16, #tpu.memory_space<vmem>>, %arg2: memref<27x32xbf16, #tpu.memory_space<vmem>>, %arg3: memref<1x32xf32, #tpu.memory_space<vmem>>, %arg4: memref<128x32xbf16, #tpu.memory_space<vmem>>) attributes {dimension_semantics = [#tpu.dimension_semantics<parallel>], iteration_bounds = array<i64: 4>, scalar_prefetch = 0 : i64, scratch_operands = 0 : i64, tpu.core_type = #tpu.core_type<tc>, window_params = [{transform_indices = @transform_0, window_bounds = array<i64: 128, 27>}, {pipeline_mode = #tpu.pipeline_mode<synchronous>, transform_indices = @transform_1, window_bounds = array<i64: 27, 32>}, {pipeline_mode = #tpu.pipeline_mode<synchronous>, transform_indices = @transform_2, window_bounds = array<i64: 1, 32>}, {transform_indices = @transform_3, window_bounds = array<i64: 128, 32>}]} {
    %c0 = arith.constant 0 : index
    %c0_0 = arith.constant 0 : index
    %0 = vector.load %arg1[%c0, %c0_0] : memref<128x27xbf16, #tpu.memory_space<vmem>>, vector<128x27xbf16>
    %c0_1 = arith.constant 0 : index
    %c0_2 = arith.constant 0 : index
    %1 = vector.load %arg2[%c0_1, %c0_2] : memref<27x32xbf16, #tpu.memory_space<vmem>>, vector<27x32xbf16>
    %cst = arith.constant dense<0.000000e+00> : vector<128x32xf32>
    %2 = tpu.matmul %0, %1, %cst {dimension_numbers = #tpu.dot_dimension_numbers<[1], [0], [0], [1], [0, 0, 1, 1], [], []>} : vector<128x27xbf16>, vector<27x32xbf16>, vector<128x32xf32> -> vector<128x32xf32>
    %c0_3 = arith.constant 0 : index
    %c0_4 = arith.constant 0 : index
    %3 = vector.load %arg3[%c0_3, %c0_4] : memref<1x32xf32, #tpu.memory_space<vmem>>, vector<1x32xf32>
    %4 = vector.broadcast %3 : vector<1x32xf32> to vector<128x32xf32>
    %5 = arith.addf %2, %4 : vector<128x32xf32>
    %cst_5 = arith.constant 0.000000e+00 : f32
    %6 = vector.broadcast %cst_5 : f32 to vector<128x32xf32>
    %7 = arith.subf %6, %5 : vector<128x32xf32>
    %8 = math.exp %7 : vector<128x32xf32>
    %cst_6 = arith.constant 1.000000e+00 : f32
    %9 = vector.broadcast %cst_6 : f32 to vector<128x32xf32>
    %10 = arith.addf %9, %8 : vector<128x32xf32>
    %11 = tpu.reciprocal %10 {approx = true} : vector<128x32xf32> -> vector<128x32xf32>
    %12 = arith.mulf %5, %11 : vector<128x32xf32>
    %13 = arith.truncf %12 : vector<128x32xf32> to vector<128x32xbf16>
    %c0_7 = arith.constant 0 : index
    %c0_8 = arith.constant 0 : index
    %14 = vector.load %arg4[%c0_7, %c0_8] : memref<128x32xbf16, #tpu.memory_space<vmem>>, vector<128x32xbf16>
    tpu.vector_store %arg4[%c0_7, %c0_8], %13 {strides = array<i32>} : memref<128x32xbf16, #tpu.memory_space<vmem>>, vector<128x32xbf16>,
    return
  }
  func.func @transform_0(%arg0: i32) -> (i32, i32) {
    %c0_i32 = arith.constant 0 : i32
    %c0_i32_0 = arith.constant 0 : i32
    return %arg0, %c0_i32 : i32, i32
  }
  func.func @transform_1(%arg0: i32) -> (i32, i32) {
    %c0_i32 = arith.constant 0 : i32
    %c0_i32_0 = arith.constant 0 : i32
    %c0_i32_1 = arith.constant 0 : i32
    return %c0_i32, %c0_i32_0 : i32, i32
  }
  func.func @transform_2(%arg0: i32) -> (i32, i32) {
    %c0_i32 = arith.constant 0 : i32
    %c0_i32_0 = arith.constant 0 : i32
    %c0_i32_1 = arith.constant 0 : i32
    return %c0_i32, %c0_i32_0 : i32, i32
  }
  func.func @transform_3(%arg0: i32) -> (i32, i32) {
    %c0_i32 = arith.constant 0 : i32
    %c0_i32_0 = arith.constant 0 : i32
    return %arg0, %c0_i32 : i32, i32
  }
}

</mosaic_0001>

<bundles_post_ra>
// kernel: tpu_custom_call.1
= control target key start
LH: loop header
LB: loop body
LE: loop exit
PB: predicated region body
PF: predicated region fallthrough
CT: control target
= control target key end

     0   :  { %s823_s12 = smov 0   ;;  %s980_s0 = inlined_call_operand.vmem [shape: bf16[512,27], index: 0, kind: input, shape index: {}]   ;;  %s981_s1 = inlined_call_operand.vmem [shape: bf16[27,32], index: 1, kind: input, shape index: {}]   ;;  %s982_s2 = inlined_call_operand.vmem [shape: f32[1,32], index: 2, kind: input, shape index: {}]   ;;  %s983_s3 = inlined_call_operand.vmem [shape: bf16[512,32], index: 3, kind: output, shape index: {}]  }
   0x1 LB: > { %s615_s13 = sadd.s32 4294967295, %s800_s12   ;;  %p619_p0 = scmp.ge.s32.totalorder %s800_s12, 1  ;;  %s800_s12 = sphi %s823_s12, %s13_s12  }
   0x2   : > { %p138_p1 = scmp.lt.s32.totalorder %s800_s12, 5 }
   0x4   : > { %p139_p2 = pnand %p619_p0, %p138_p1 }
   0x5   : > { %s620_s16 = sshll.u32 (!%p139_p2), %s615_s13, 4 }
   0x6   : > { %142 = sbr.rel (%p139_p2) target bundleno = 278 (0x116), region = 32  ;;  %p163_p3 = scmp.lt.s32.totalorder (!%p139_p2), %s620_s16, 63 }
   0xb   : > { %v720_v0 = vld [vmem:[%s981_s1 + $0x8] sm:$0x3f]   ;;  %vm278_vm0 = vcmask 1044480   ;;  %vm279_vm1 = vcmask 1045504   ;;  %v802_v1 = vmov 65535   ;;  %v721_v5 = vld [vmem:[%s981_s1] sm:$0xff]  }
   0xc   : > { %v280_v2 = vsel %vm278_vm0, 4294967295, %v802_v1  ;;  %s985_s16 = smov (!%p163_p3, %s620_s16), 63  ;;  %vm253_vm2 = vcmask 220160   ;;  %v856_v14 = vld [vmem:[%s982_s2] ss:$0 sm:$0xff]  ;;  %vm542_vm3 = vcmask 257024  }
   0xd   : > { %v281_v3 = vsel %vm279_vm1, %v280_v2, 0  ;;  %s621_s19 = sshll.u32 %s985_s16, 2 }
   0xe   : > { %v283_v4 = vand.u32 %v720_v0, %v281_v3  ;;  %s166_s22 = scalar_lea.vmem %s980_s0, %s621_s19  ;;  %s928_s27 = scalar_lea.vmem %s983_s3, %s621_s19 }
   0xf   : > { %v722_v6 = vld [vmem:[%s166_s22] sm:$0xff]   ;;  %v724_v8 = vld [vmem:[%s166_s22 + $0x8] sm:$0xff]   ;;  %v726_v10 = vld [vmem:[%s166_s22 + $0x10] sm:$0xff]  }
  0x10   : > { %687 = vmatprep.subr.bf16.mxu0 %v283_v4  ;;  %707 = vmatprep.subr.bf16.mxu1 %v283_v4  ;;  %v723_v7 = vld [vmem:[%s166_s22 + $0x20] sm:$0xff]   ;;  %v725_v9 = vld [vmem:[%s166_s22 + $0x28] sm:$0xff]   ;;  %v727_v11 = vld [vmem:[%s166_s22 + $0x30] sm:$0xff]  }
  0x11   : > { %688 = vmatpush3.bf16.msra.mxu0 %v283_v4  ;;  %709 = vmatpush3.bf16.msra.mxu1 %v283_v4  ;;  %v728_v12 = vld [vmem:[%s166_s22 + $0x18] sm:$0xff]  }
  0x12   : > { %689 = vmatprep.subr.bf16.mxu0 %v721_v5  ;;  %708 = vmatprep.subr.bf16.mxu1 %v721_v5  ;;  %v729_v13 = vld [vmem:[%s166_s22 + $0x38] sm:$0xff]  }
  0x13   : > { %691 = vmatprep.mubr.msk.bf16.mxu0 %vm253_vm2, %v722_v6  ;;  %699 = vmatprep.mubr.msk.bf16.mxu1 %vm253_vm2, %v723_v7 }
  0x15   : > { %690 = vmatpush3.bf16.msra.mxu0 %v721_v5  ;;  %710 = vmatpush3.bf16.msra.mxu1 %v721_v5 }
  0x18   : > { %692 = vmatmul.mubr.msk.bf16.vlgmr.msra.gmra.mxu0 %vm253_vm2, %v724_v8  ;;  %700 = vmatmul.mubr.msk.bf16.vlgmr.msra.gmra.mxu1 %vm253_vm2, %v725_v9 }
  0x19   : > { %695 = vmatprep.mubr.msk.bf16.mxu0 %vm253_vm2, %v726_v10  ;;  %703 = vmatprep.mubr.msk.bf16.mxu1 %vm253_vm2, %v727_v11 }
  0x20   : > { %696 = vmatmul.mubr.msk.bf16.gmra.mxu0 %vm253_vm2, %v728_v12  ;;  %704 = vmatmul.mubr.msk.bf16.gmra.mxu1 %vm253_vm2, %v729_v13 }
  0xd8   : > { %v693_v15 = vpop.f32.mrf.mxu0  ;;  %v701_v16 = vpop.f32.mrf.mxu1 }
  0xd9   : > { %v859_v17 = vadd.f32 %v693_v15, %v856_v14  ;;  %v862_v18 = vadd.f32 %v701_v16, %v856_v14 }
  0xda   : > { %v319_v19 = vpop.f32.mrf.mxu0  ;;  %v351_v20 = vpop.f32.mrf.mxu1 }
  0xdb   : > { %v384_v21 = vsub.f32 0.0, %v859_v17  ;;  %v392_v22 = vsub.f32 0.0, %v862_v18  ;;  %v867_v23 = vadd.f32 %v856_v14, %v319_v19  ;;  %v870_v24 = vadd.f32 %v856_v14, %v351_v20 }
  0xdc   : > { %v694_v25 = vpop.f32.mrf.mxu0  ;;  %v702_v26 = vpop.f32.mrf.mxu1 }
  0xdd   : > { %v402_v27 = vmul.f32 1.442695, %v384_v21  ;;  %v418_v28 = vmul.f32 1.442695, %v392_v22  ;;  %v382_v29 = vsub.f32 0.0, %v867_v23  ;;  %v390_v30 = vsub.f32 0.0, %v870_v24 }
  0xde   : > { %v875_v31 = vadd.f32 %v694_v25, %v856_v14  ;;  %v878_v32 = vadd.f32 %v702_v26, %v856_v14  ;;  %v322_v33 = vpop.f32.mrf.mxu0  ;;  %v354_v34 = vpop.f32.mrf.mxu1 }
  0xdf   : > { %730 = vpow2.f32 %v402_v27  ;;  %v398_v35 = vmul.f32 1.442695, %v382_v29  ;;  %v414_v36 = vmul.f32 1.442695, %v390_v30  ;;  %v881_v37 = vadd.f32 %v856_v14, %v322_v33 }
  0xe0   : > { %732 = vpow2.f32 %v418_v28  ;;  %v385_v38 = vsub.f32 0.0, %v875_v31  ;;  %v393_v39 = vsub.f32 0.0, %v878_v32  ;;  %v886_v40 = vadd.f32 %v856_v14, %v354_v34  ;;  %v697_v41 = vpop.f32.mrf.mxu0  ;;  %v705_v42 = vpop.f32.mrf.mxu1 }
  0xe1   : > { %734 = vpow2.f32 %v398_v35  ;;  %v383_v43 = vsub.f32 0.0, %v881_v37  ;;  %v890_v44 = vadd.f32 %v697_v41, %v856_v14  ;;  %v893_v45 = vadd.f32 %v705_v42, %v856_v14 }
  0xe2   : > { %736 = vpow2.f32 %v414_v36  ;;  %v404_v46 = vmul.f32 1.442695, %v385_v38  ;;  %v420_v47 = vmul.f32 1.442695, %v393_v39  ;;  %v391_v48 = vsub.f32 0.0, %v886_v40  ;;  %v335_v49 = vpop.f32.mrf.mxu0  ;;  %v367_v50 = vpop.f32.mrf.mxu1 }
  0xe3   : > { %v400_v51 = vmul.f32 1.442695, %v383_v43  ;;  %v388_v52 = vsub.f32 0.0, %v890_v44  ;;  %v396_v53 = vsub.f32 0.0, %v893_v45  ;;  %v899_v54 = vadd.f32 %v856_v14, %v335_v49 }
  0xe4   : > { %738 = vpow2.f32 %v404_v46  ;;  %v416_v55 = vmul.f32 1.442695, %v391_v48  ;;  %v902_v56 = vadd.f32 %v856_v14, %v367_v50  ;;  %v698_v57 = vpop.f32.mrf.mxu0  ;;  %v706_v58 = vpop.f32.mrf.mxu1 }
  0xe5   : > { %740 = vpow2.f32 %v420_v47  ;;  %v410_v59 = vmul.f32 1.442695, %v388_v52  ;;  %v426_v60 = vmul.f32 1.442695, %v396_v53  ;;  %v386_v61 = vsub.f32 0.0, %v899_v54 }
  0xe6   : > { %742 = vpow2.f32 %v400_v51  ;;  %v394_v62 = vsub.f32 0.0, %v902_v56  ;;  %v907_v63 = vadd.f32 %v698_v57, %v856_v14  ;;  %v910_v0 = vadd.f32 %v706_v58, %v856_v14  ;;  %v338_v1 = vpop.f32.mrf.mxu0  ;;  %v370_v2 = vpop.f32.mrf.mxu1 }
  0xe7   : > { %744 = vpow2.f32 %v416_v55  ;;  %v406_v3 = vmul.f32 1.442695, %v386_v61  ;;  %v913_v4 = vadd.f32 %v856_v14, %v338_v1  ;;  %v916_v5 = vadd.f32 %v856_v14, %v370_v2 }
  0xe8   : > { %746 = vpow2.f32 %v410_v59  ;;  %v422_v6 = vmul.f32 1.442695, %v394_v62  ;;  %v389_v7 = vsub.f32 0.0, %v907_v63  ;;  %v397_v8 = vsub.f32 0.0, %v910_v0 }
  0xe9   : > { %748 = vpow2.f32 %v426_v60  ;;  %v387_v9 = vsub.f32 0.0, %v913_v4  ;;  %v395_v13 = vsub.f32 0.0, %v916_v5 }
  0xea   : > { %750 = vpow2.f32 %v406_v3  ;;  %v412_v10 = vmul.f32 1.442695, %v389_v7  ;;  %v428_v11 = vmul.f32 1.442695, %v397_v8 }
  0xeb   : > { %752 = vpow2.f32 %v422_v6  ;;  %v408_v12 = vmul.f32 1.442695, %v387_v9  ;;  %v424_v25 = vmul.f32 1.442695, %v395_v13 }
  0xec   : > { %v731_v15 = vpop.eup %730  ;;  %754 = vpow2.f32 %v412_v10 }
  0xed   : > { %v733_v14 = vpop.eup %732  ;;  %v432_v16 = vadd.f32 1.0, %v731_v15  ;;  %756 = vpow2.f32 %v428_v11 }
  0xee   : > { %v735_v19 = vpop.eup %734  ;;  %v440_v20 = vadd.f32 1.0, %v733_v14  ;;  %758 = vpow2.f32 %v408_v12 }
  0xef   : > { %v737_v21 = vpop.eup %736  ;;  %760 = vrcp.f32 %v432_v16  ;;  %v430_v22 = vadd.f32 1.0, %v735_v19 }
  0xf0   : > { %762 = vrcp.f32 %v440_v20  ;;  %v438_v26 = vadd.f32 1.0, %v737_v21 }
  0xf1   : > { %v739_v27 = vpop.eup %738  ;;  %764 = vrcp.f32 %v430_v22 }
  0xf2   : > { %v741_v28 = vpop.eup %740  ;;  %766 = vrcp.f32 %v438_v26  ;;  %v433_v29 = vadd.f32 1.0, %v739_v27 }
  0xf3   : > { %v743_v30 = vpop.eup %742  ;;  %v441_v33 = vadd.f32 1.0, %v741_v28  ;;  %768 = vpow2.f32 %v424_v25 }
  0xf4   : > { %v745_v34 = vpop.eup %744  ;;  %770 = vrcp.f32 %v433_v29  ;;  %v431_v35 = vadd.f32 1.0, %v743_v30 }
  0xf5   : > { %v747_v36 = vpop.eup %746  ;;  %772 = vrcp.f32 %v441_v33  ;;  %v439_v38 = vadd.f32 1.0, %v745_v34 }
  0xf6   : > { %v749_v39 = vpop.eup %748  ;;  %774 = vrcp.f32 %v431_v35  ;;  %v436_v41 = vadd.f32 1.0, %v747_v36 }
  0xf7   : > { %v751_v42 = vpop.eup %750  ;;  %776 = vrcp.f32 %v439_v38  ;;  %v444_v43 = vadd.f32 1.0, %v749_v39 }
  0xf8   : > { %v753_v46 = vpop.eup %752  ;;  %778 = vrcp.f32 %v436_v41  ;;  %v434_v47 = vadd.f32 1.0, %v751_v42 }
  0xf9   : > { %v755_v48 = vpop.eup %754  ;;  %780 = vrcp.f32 %v444_v43  ;;  %v442_v49 = vadd.f32 1.0, %v753_v46 }
  0xfa   : > { %v757_v50 = vpop.eup %756  ;;  %782 = vrcp.f32 %v434_v47  ;;  %v437_v51 = vadd.f32 1.0, %v755_v48 }
  0xfb   : > { %v759_v52 = vpop.eup %758  ;;  %784 = vrcp.f32 %v442_v49  ;;  %v445_v53 = vadd.f32 1.0, %v757_v50 }
  0xfc   : > { %v761_v55 = vpop.eup %760  ;;  %786 = vrcp.f32 %v437_v51  ;;  %v435_v57 = vadd.f32 1.0, %v759_v52 }
  0xfd   : > { %v763_v58 = vpop.eup %762  ;;  %v464_v59 = vmul.f32 %v761_v55, %v859_v17  ;;  %788 = vrcp.f32 %v445_v53 }
  0xfe   : > { %v765_v60 = vpop.eup %764  ;;  %v472_v61 = vmul.f32 %v763_v58, %v862_v18  ;;  %790 = vrcp.f32 %v435_v57 }
  0xff   : > { %v767_v62 = vpop.eup %766  ;;  %v663_v1 = vpack.c.bf16 %v464_v59, %v464_v59  ;;  %v462_v2 = vmul.f32 %v765_v60, %v867_v23 }
 0x100   : > { %v769_v17 = vpop.eup %768  ;;  %v671_v3 = vpack.c.bf16 %v472_v61, %v472_v61  ;;  %v470_v6 = vmul.f32 %v767_v62, %v870_v24 }
 0x101   : > { %v771_v7 = vpop.eup %770  ;;  %545 = vst.msk [vmem:[%s928_s27 + $0x8] sm:$0xf] %vm542_vm3, %v663_v1  ;;  %v661_v8 = vpack.c.bf16 %v462_v2, %v462_v2  ;;  %v443_v9 = vadd.f32 1.0, %v769_v17 }
 0x102   : > { %v773_v10 = vpop.eup %772  ;;  %553 = vst.msk [vmem:[%s928_s27 + $0x28] sm:$0xf] %vm542_vm3, %v671_v3  ;;  %v669_v18 = vpack.c.bf16 %v470_v6, %v470_v6  ;;  %v465_v11 = vmul.f32 %v771_v7, %v875_v31 }
 0x103   : > { %v775_v12 = vpop.eup %774  ;;  %543 = vst.msk [vmem:[%s928_s27] sm:$0xf] %vm542_vm3, %v661_v8  ;;  %v473_v23 = vmul.f32 %v773_v10, %v878_v32  ;;  %792 = vrcp.f32 %v443_v9 }
 0x104   : > { %v777_v24 = vpop.eup %776  ;;  %551 = vst.msk [vmem:[%s928_s27 + $0x20] sm:$0xf] %vm542_vm3, %v669_v18  ;;  %v664_v13 = vpack.c.bf16 %v465_v11, %v465_v11  ;;  %v463_v15 = vmul.f32 %v775_v12, %v881_v37 }
 0x105   : > { %v779_v14 = vpop.eup %778  ;;  %v672_v16 = vpack.c.bf16 %v473_v23, %v473_v23  ;;  %v471_v19 = vmul.f32 %v777_v24, %v886_v40 }
 0x106   : > { %v781_v31 = vpop.eup %780  ;;  %546 = vst.msk [vmem:[%s928_s27 + $0xc] sm:$0xf] %vm542_vm3, %v664_v13  ;;  %v662_v20 = vpack.c.bf16 %v463_v15, %v463_v15  ;;  %v468_v32 = vmul.f32 %v779_v14, %v890_v44 }
 0x107   : > { %v783_v21 = vpop.eup %782  ;;  %554 = vst.msk [vmem:[%s928_s27 + $0x2c] sm:$0xf] %vm542_vm3, %v672_v16  ;;  %v670_v22 = vpack.c.bf16 %v471_v19, %v471_v19  ;;  %v476_v25 = vmul.f32 %v781_v31, %v893_v45 }
 0x108   : > { %v785_v37 = vpop.eup %784  ;;  %544 = vst.msk [vmem:[%s928_s27 + $0x4] sm:$0xf] %vm542_vm3, %v662_v20  ;;  %v667_v26 = vpack.c.bf16 %v468_v32, %v468_v32  ;;  %v466_v40 = vmul.f32 %v783_v21, %v899_v54 }
 0x109   : > { %v787_v27 = vpop.eup %786  ;;  %552 = vst.msk [vmem:[%s928_s27 + $0x24] sm:$0xf] %vm542_vm3, %v670_v22  ;;  %v675_v44 = vpack.c.bf16 %v476_v25, %v476_v25  ;;  %v474_v28 = vmul.f32 %v785_v37, %v902_v56 }
 0x10a   : > { %v789_v29 = vpop.eup %788  ;;  %549 = vst.msk [vmem:[%s928_s27 + $0x18] sm:$0xf] %vm542_vm3, %v667_v26  ;;  %v665_v45 = vpack.c.bf16 %v466_v40, %v466_v40  ;;  %v469_v30 = vmul.f32 %v787_v27, %v907_v63 }
 0x10b   : > { %v791_v33 = vpop.eup %790  ;;  %557 = vst.msk [vmem:[%s928_s27 + $0x38] sm:$0xf] %vm542_vm3, %v675_v44  ;;  %v673_v54 = vpack.c.bf16 %v474_v28, %v474_v28  ;;  %v477_v34 = vmul.f32 %v789_v29, %v910_v0 }
 0x10c   : > { %547 = vst.msk [vmem:[%s928_s27 + $0x10] sm:$0xf] %vm542_vm3, %v665_v45  ;;  %v668_v35 = vpack.c.bf16 %v469_v30, %v469_v30  ;;  %v467_v56 = vmul.f32 %v791_v33, %v913_v4 }
 0x10d   : > { %555 = vst.msk [vmem:[%s928_s27 + $0x30] sm:$0xf] %vm542_vm3, %v673_v54  ;;  %v676_v36 = vpack.c.bf16 %v477_v34, %v477_v34 }
 0x10e   : > { %550 = vst.msk [vmem:[%s928_s27 + $0x1c] sm:$0xf] %vm542_vm3, %v668_v35  ;;  %v666_v38 = vpack.c.bf16 %v467_v56, %v467_v56 }
 0x10f   : > { %558 = vst.msk [vmem:[%s928_s27 + $0x3c] sm:$0xf] %vm542_vm3, %v676_v36 }
 0x110   : > { %v793_v63 = vpop.eup %792  ;;  %548 = vst.msk [vmem:[%s928_s27 + $0x14] sm:$0xf] %vm542_vm3, %v666_v38 }
 0x111   : > { %v475_v39 = vmul.f32 %v793_v63, %v916_v5 }
 0x113   : > { %v674_v41 = vpack.c.bf16 %v475_v39, %v475_v39 }
 0x115   : > { %556 = vst.msk [vmem:[%s928_s27 + $0x34] sm:$0xf] %vm542_vm3, %v674_v41 }
 0x116 PF: > { %s13_s12 = sadd.s32 1, %s800_s12  }
 0x117   : > { %p10_p4 = scmp.ge.s32.totalorder %s13_s12, 6  }
 0x119   :  { %12 = sbr.rel (!%p10_p4) target bundleno = 1 (0x1), region = 62 }

</bundles_post_ra>
